<compile_context>
chip_gen: v5e
topology: v5e:2x2
jax: 0.10.0
libtpu: 0.0.40
codegen_flags: <defaults>
</compile_context>

<pallas_src>
import jax
import jax.numpy as jnp
import numpy as np
from jax.experimental import pallas as pl
from jax.experimental.pallas import tpu as pltpu


def _motion_enhance_kernel(scal_ref, x_ref, o_ref):
    # scal_ref: SMEM scalar-prefetch, (2,) = [lam, 1/(1-lam)]
    # x_ref / o_ref: (BC_TILE, T, HW_pad) VMEM tiles
    lam = scal_ref[0]
    scale = scal_ref[1]
    x = x_ref[...]
    mean = jnp.mean(x, axis=1, keepdims=True)   # per-(b,c) temporal mean
    o_ref[...] = (x - mean * lam) * scale


def motion_enhance(x, lam, *, target_block_bytes=4 << 20):
    """x: (B, C, T, H, W) float32, lam: scalar float32."""
    b, c, t, h, w = x.shape
    bc = b * c
    hw = h * w
    x2 = x.reshape(bc, t, hw)

    # Lane-dense last dim: pad H*W up to a multiple of 128 (avoids masked
    # partial stores for shapes like 7x7=49); slice back after the kernel.
    hw_pad = ((hw + 127) // 128) * 128
    if hw_pad != hw:
        x2 = jnp.pad(x2, ((0, 0), (0, 0), (0, hw_pad - hw)))

    # Block over B*C so each block is ~target_block_bytes (<= ~8 MiB keeps
    # 4 double-buffered buffers well under v7x's 64 MiB / v5e's 16 MiB scoped).
    slab_bytes = t * hw_pad * 4
    bc_tile = max(1, target_block_bytes // slab_bytes)
    if bc >= 2:
        bc_tile = min(bc_tile, (bc + 1) // 2)   # keep >= 2 grid steps (v7x 2 TCs)
    bc_tile = int(min(bc_tile, bc))
    grid = (pl.cdiv(bc, bc_tile),)

    block_bytes = bc_tile * slab_bytes
    # 2 input + 2 output double-buffered blocks, plus headroom.
    vmem_limit = int(min(max(4 * block_bytes + (4 << 20), 16 << 20), 64 << 20))

    total = bc * t * hw_pad
    cost = pl.CostEstimate(
        flops=5 * total, transcendentals=0, bytes_accessed=2 * total * 4
    )

    lam = jnp.asarray(lam, jnp.float32)
    scalars = jnp.stack([lam, 1.0 / (1.0 - lam)])  # hoist divide out of the grid

    out2 = pl.pallas_call(
        _motion_enhance_kernel,
        out_shape=jax.ShapeDtypeStruct((bc, t, hw_pad), jnp.float32),
        grid_spec=pltpu.PrefetchScalarGridSpec(
            num_scalar_prefetch=1,
            grid=grid,
            in_specs=[
                pl.BlockSpec((bc_tile, t, hw_pad), lambda i, scal: (i, 0, 0)),
            ],
            out_specs=pl.BlockSpec((bc_tile, t, hw_pad), lambda i, scal: (i, 0, 0)),
        ),
        compiler_params=pltpu.CompilerParams(
            dimension_semantics=("parallel",),
            vmem_limit_bytes=vmem_limit,
        ),
        cost_estimate=cost,
    )(scalars, x2)

    if hw_pad != hw:
        out2 = out2[:, :, :hw]
    return out2.reshape(b, c, t, h, w)


if __name__ == "__main__":
    key = jax.random.PRNGKey(0)
    kx, klam = jax.random.split(key)

    # Small shapes consistent with the module's 5-D (B, C, T, H, W) input.
    B, C, T, H, W = 2, 4, 8, 16, 16
    x = jax.random.normal(kx, (B, C, T, H, W), dtype=jnp.float32)

    beta, maxium_radio = 1.0, 0.3
    # TODO(synk): PyTorch draws lam with np.random.beta per forward; here it is
    # a deterministic Beta sample so the run is reproducible.
    lam = jax.random.beta(klam, beta, beta) * maxium_radio

    out = motion_enhance(x, lam)
    out = jax.block_until_ready(out)

    # Reference check in plain JAX (same semantics as the PyTorch forward).
    mean = jnp.mean(x, axis=2, keepdims=True)
    ref = (x - mean * lam) * (1.0 / (1.0 - lam))
    np.testing.assert_allclose(np.asarray(out), np.asarray(ref), rtol=1e-5, atol=1e-5)

    print("KERNEL_OK")
</pallas_src>

<mosaic_0001>
module attributes {stable_mosaic.version = 11 : i64} {
  func.func @_motion_enhance_kernel(%arg0: i32, %arg1: memref<2xf32, #tpu.memory_space<smem>>, %arg2: memref<4x8x256xf32, #tpu.memory_space<vmem>>, %arg3: memref<4x8x256xf32, #tpu.memory_space<vmem>>) attributes {dimension_semantics = [#tpu.dimension_semantics<parallel>], iteration_bounds = array<i64: 2>, scalar_prefetch = 1 : i64, scratch_operands = 0 : i64, tpu.core_type = #tpu.core_type<tc>, window_params = [{transform_indices = @transform_0, window_bounds = array<i64: 4, 8, 256>}, {transform_indices = @transform_1, window_bounds = array<i64: 4, 8, 256>}]} {
    %c0 = arith.constant 0 : index
    %0 = memref.load %arg1[%c0] : memref<2xf32, #tpu.memory_space<smem>>
    %c1 = arith.constant 1 : index
    %1 = memref.load %arg1[%c1] : memref<2xf32, #tpu.memory_space<smem>>
    %c0_0 = arith.constant 0 : index
    %c0_1 = arith.constant 0 : index
    %c0_2 = arith.constant 0 : index
    %2 = vector.load %arg2[%c0_0, %c0_1, %c0_2] : memref<4x8x256xf32, #tpu.memory_space<vmem>>, vector<4x8x256xf32>
    %cst = arith.constant dense<0.000000e+00> : vector<4x256xf32>
    %3 = vector.multi_reduction <add>, %2, %cst [1] : vector<4x8x256xf32> to vector<4x256xf32>
    %4 = vector.shape_cast %3 : vector<4x256xf32> to vector<4x1x256xf32>
    %cst_3 = arith.constant 8.000000e+00 : f32
    %5 = vector.broadcast %cst_3 : f32 to vector<4x1x256xf32>
    %6 = arith.divf %4, %5 : vector<4x1x256xf32>
    %7 = vector.broadcast %0 : f32 to vector<4x1x256xf32>
    %8 = arith.mulf %6, %7 : vector<4x1x256xf32>
    %9 = vector.broadcast %8 : vector<4x1x256xf32> to vector<4x8x256xf32>
    %10 = arith.subf %2, %9 : vector<4x8x256xf32>
    %11 = vector.broadcast %1 : f32 to vector<4x8x256xf32>
    %12 = arith.mulf %10, %11 : vector<4x8x256xf32>
    %c0_4 = arith.constant 0 : index
    %c0_5 = arith.constant 0 : index
    %c0_6 = arith.constant 0 : index
    %13 = vector.load %arg3[%c0_4, %c0_5, %c0_6] : memref<4x8x256xf32, #tpu.memory_space<vmem>>, vector<4x8x256xf32>
    tpu.vector_store %arg3[%c0_4, %c0_5, %c0_6], %12 {strides = array<i32>} : memref<4x8x256xf32, #tpu.memory_space<vmem>>, vector<4x8x256xf32>,
    return
  }
  func.func @transform_0(%arg0: i32, %arg1: memref<2xf32, #tpu.memory_space<smem>>) -> (i32, i32, i32) {
    %c0_i32 = arith.constant 0 : i32
    %c0_i32_0 = arith.constant 0 : i32
    %c0_i32_1 = arith.constant 0 : i32
    return %arg0, %c0_i32, %c0_i32_0 : i32, i32, i32
  }
  func.func @transform_1(%arg0: i32, %arg1: memref<2xf32, #tpu.memory_space<smem>>) -> (i32, i32, i32) {
    %c0_i32 = arith.constant 0 : i32
    %c0_i32_0 = arith.constant 0 : i32
    %c0_i32_1 = arith.constant 0 : i32
    return %arg0, %c0_i32, %c0_i32_0 : i32, i32, i32
  }
}

</mosaic_0001>

<bundles_post_ra>
// kernel: tpu_custom_call.1
= control target key start
LH: loop header
LB: loop body
LE: loop exit
PB: predicated region body
PF: predicated region fallthrough
CT: control target
= control target key end

     0   :  { %s533_s12 = smov [#allocation3]   ;;  %s759_s0 = inlined_call_operand.hbm [shape: f32[2], index: 0, kind: input, shape index: {}]   ;;  %s760_s1 = inlined_call_operand.hbm [shape: f32[8,8,256], index: 1, kind: input, shape index: {}]   ;;  %s761_s2 = inlined_call_operand.hbm [shape: f32[8,8,256], index: 2, kind: output, shape index: {}]  }
   0x1   :  { %s8_s11 = sshll.u32 %s759_s0, 4  ;;  %s9_s11 = int_to_ptr.hbm [resolvable:$true] %s8_s11 }
   0x2   :  { %11 = dma.hbm_to_smem %s9_s11, 16, %s533_s12, [#allocation2] }
   0x3   :  { %507 = dma.done.wait [#allocation2], 16 }
   0x4   :  { %508 = vsyncadd [#allocation2], 4294967280 }
   0x5   :  { %14 = sfence }
   0x6   :  { %15 = vsyncpa [#allocation5], 0 }
   0x7   :  { %17 = vsyncpa [#allocation5 + $0x1], 0 }
   0x8   :  { %18 = vsyncpa [#allocation6], 0 }
   0x9   :  { %20 = vsyncpa [#allocation6 + $0x1], 0  ;;  %s557_s13 = smov 0   ;;  %s559_s14 = smov 0  }
   0xa   :  { %s561_s15 = smov 0   ;;  %s563_s16 = smov 0  }
   0xb LB: > { %s578_s0 = sadd.s32 4294967295, %s531_s16   ;;  %s346_s17 = sadd.s32 4294967294, %s531_s16   ;;  %s531_s16 = sphi %s563_s16, %s771_s16   ;;  %s527_s15 = sphi %s561_s15, %s770_s15   ;;  %s523_s14 = sphi %s559_s14, %s769_s14   ;;  %s519_s13 = sphi %s557_s13, %s768_s13  }
   0xc   : > { %s582_s18 = sadd.s32 1, %s531_s16   ;;  %s33_s19 = sadd.s32 1, %s527_s15 }
   0xd   : > { %s30_s20 = ssub.s32 %s531_s16, %s582_s18  ;;  %p40_p0 = scmp.ne.s32.totalorder %s527_s15, %s523_s14 }
   0xe   : > { %p31_p1 = scmp.eq.s32.totalorder %s30_s20, 0  ;;  %p41_p2 = scmp.eq.s32.totalorder %s531_s16, 0 }
   0xf   : > { %p46_p3 = scmp.ne.s32.totalorder %s523_s14, %s519_s13  ;;  %p47_p4 = scmp.eq.s32.totalorder %s578_s0, 0 }
  0x10   : > { %s594_s21 = scalar_select %p31_p1, %s527_s15, %s33_s19  }
  0x11   : > { %p596_p5 = por %p41_p2, %p40_p0  ;;  %p600_p6 = por %p47_p4, %p46_p3 }
  0x12   : > { %p70_p7 = scmp.eq.s32.totalorder %s578_s0, 1  ;;  %p76_p8 = scmp.eq.s32.totalorder %s346_s17, 1 }
  0x13   : > { %p379_p10 = scmp.lt.s32.totalorder %s531_s16, 2  ;;  %s96_s26 = sand.u32 1, %s527_s15  }
  0x14   : > { %p607_p11 = por %p70_p7, %p40_p0  ;;  %p611_p12 = por %p76_p8, %p46_p3 }
  0x15   : > { %s364_s27 = sshll.u32 %s531_s16, 6  ;;  %s349_s28 = sshll.u32 %s96_s26, 6 }
  0x16   : > { %s106_s3 = scalar_lea.hbm %s760_s1, %s364_s27  ;;  %s100_s5 = scalar_lea.vmem [#allocation4], %s349_s28 }
  0x17   : > { %s107_s4 = sshll.u32 %s106_s3, 4  ;;  %s109_s6 = sshll.u32 %s100_s5, 4  ;;  %s108_s4 = int_to_ptr.hbm [resolvable:$true] %s107_s4  ;;  %s110_s6 = int_to_ptr.vmem [resolvable:$true] %s109_s6 }
  0x18   : > { %p622_p13 = pnand %p379_p10, %p596_p5  ;;  %p353_p0 = scmp.ge.s32.totalorder %s531_s16, 1 }
  0x19   : > { %p117_p1 = scmp.lt.s32.totalorder %s531_s16, 3  ;;  %s97_s8 = scalar_lea.sflag [#allocation5], %s96_s26 }
  0x1a   : > { %s433_s9 = sshra.s32 %s108_s4, 4  ;;  %p437_p3 = pneg %p622_p13  ;;  %s434_s9 = int_to_ptr.hbm [resolvable:$true] %s433_s9 }
  0x1b   : > { %s435_s10 = scalar_lea.hbm %s434_s9, 64  ;;  %s440_s17 = scalar_lea.hbm %s760_s1, 128 }
  0x1c   : > { %p436_p2 = scmp.ne.s32.totalorder %s434_s9, %s435_s10  ;;  %p441_p5 = scmp.lt.s32.totalorder %s434_s9, %s760_s1 }
  0x1d   : > { %p442_p8 = scmp.lt.s32.totalorder %s440_s17, %s435_s10 }
  0x1e   : > { %p438_p4 = pnand %p437_p3, %p436_p2 }
  0x1f   : > { %p443_p10 = por %p442_p8, %p441_p5 }
  0x20   : > { %p439_p7 = pneg %p438_p4 }
  0x22   : > { %p444_p9 = pnand %p443_p10, %p439_p7 }
  0x24   : > { %447 = shalt.err (!%p444_p9)
}
  0x25   : > { %s534_s22 = smov 256   ;;  %s535_s26 = smov 16  }
  0x26   : > { %374 = dma.hbm_to_vmem [thread:$0]  (!%p622_p13), %s108_s4, 1024, %s110_s6, %s97_s8, %s534_s22, %s534_s22, %s535_s26  }
  0x27   : > { %p118_p2 = pnand %p353_p0, %p117_p1 }
  0x28   : > { %s643_s27 = sand.u32 (!%p118_p2), 1, %s523_s14  }
  0x29   : > { %121 = sbr.rel (%p118_p2) target bundleno = 83 (0x53), region = 24  ;;  %s354_s28 = sshll.u32 (!%p118_p2), %s643_s27, 6 }
  0x2a   : > { %s124_s29 = scalar_lea.sflag (!%p118_p2), [#allocation5], %s643_s27  ;;  %s649_s30 = scalar_lea.vmem (!%p118_p2), [#allocation4], %s354_s28 }
  0x2e   : > { %510 = dma.done.wait (%p600_p6), %s124_s29, 1024  }
  0x2f   : > { %512 = vsyncadd (%p600_p6), %s124_s29, 4294966272  ;;  %s149_s3 = sld [smem:[#allocation3]]  ;;  %v536_v0 = vmov 8.0   ;;  %v656_v2 = vld [vmem:[%s649_s30] sm:$0xff]  ;;  %v661_v4 = vld [vmem:[%s649_s30 + $0x8] sm:$0xff]  ;;  %s366_s23 = sshll.u32 %s578_s0, 6 }
  0x30   : > { %419 = vrcp.f32 %v536_v0  ;;  %s356_s4 = sld [smem:[#allocation3 + $0x1]]  ;;  %v664_v5 = vld [vmem:[%s649_s30 + $0x10] sm:$0xff]  ;;  %v159_v6 = vrot.slane %v656_v2, 4  ;;  %v670_v9 = vld [vmem:[%s649_s30 + $0x18] sm:$0xff]  ;;  %v673_v10 = vld [vmem:[%s649_s30 + $0x20] sm:$0xff]  ;;  %v165_v12 = vrot.slane %v661_v4, 4  ;;  %s269_s8 = scalar_lea.hbm %s761_s2, %s366_s23 }
  0x31   : > { %v676_v11 = vld [vmem:[%s649_s30 + $0x28] sm:$0xff]  ;;  %v171_v13 = vrot.slane %v664_v5, 4  ;;  %v177_v14 = vrot.slane %v670_v9, 4  ;;  %v183_v15 = vrot.slane %v673_v10, 4  ;;  %v683_v16 = vld [vmem:[%s649_s30 + $0x30] sm:$0xff]  ;;  %v695_v41 = vld [vmem:[%s649_s30 + $0x38] sm:$0xff] }
  0x32   : > { %v160_v17 = vadd.f32 %v159_v6, %v656_v2  ;;  %v189_v19 = vrot.slane %v676_v11, 4  ;;  %v195_v20 = vrot.slane %v683_v16, 4  ;;  %v166_v21 = vadd.f32 %v165_v12, %v661_v4  ;;  %s146_s5 = scalar_lea.vmem [#allocation7], %s354_s28  ;;  %s272_s9 = sshll.u32 %s269_s8, 4  ;;  %s273_s9 = int_to_ptr.hbm [resolvable:$true] %s272_s9 }
  0x33   : > { %v172_v22 = vadd.f32 %v171_v13, %v664_v5  ;;  %v178_v23 = vadd.f32 %v177_v14, %v670_v9  ;;  %v184_v24 = vadd.f32 %v183_v15, %v673_v10  ;;  %v201_v53 = vrot.slane %v695_v41, 4  ;;  %s270_s0 = sshll.u32 %s146_s5, 4  ;;  %s257_s10 = scalar_lea.sflag [#allocation6], %s643_s27  ;;  %s271_s0 = int_to_ptr.vmem [resolvable:$true] %s270_s0 }
  0x34   : > { %v161_v25 = vrot.slane %v160_v17, 2  ;;  %v190_v27 = vadd.f32 %v189_v19, %v676_v11  ;;  %v196_v28 = vadd.f32 %v195_v20, %v683_v16  ;;  %v167_v29 = vrot.slane %v166_v21, 2  ;;  %s477_s11 = sshra.s32 %s273_s9, 4  ;;  %s483_s20 = scalar_lea.hbm %s761_s2, 128  ;;  %s478_s11 = int_to_ptr.hbm [resolvable:$true] %s477_s11 }
  0x35   : > { %v658_v3 = vstv %s149_s3  ;;  %v173_v30 = vrot.slane %v172_v22, 2  ;;  %v179_v31 = vrot.slane %v178_v23, 2  ;;  %v185_v32 = vrot.slane %v184_v24, 2  ;;  %s479_s12 = scalar_lea.hbm %s478_s11, 64  ;;  %p484_p0 = scmp.lt.s32.totalorder %s478_s11, %s761_s2 }
  0x36   : > { %v420_v1 = vpop.eup %419  ;;  %v667_v8 = vstv %s356_s4  ;;  %v162_v33 = vadd.f32 %v161_v25, %v160_v17  ;;  %v191_v35 = vrot.slane %v190_v27, 2  ;;  %v197_v36 = vrot.slane %v196_v28, 2  ;;  %p480_p6 = scmp.ne.s32.totalorder %s478_s11, %s479_s12  ;;  %p485_p1 = scmp.lt.s32.totalorder %s483_s20, %s479_s12 }
  0x37   : > { %v208_v7 = vmul.f32 8.0, %v420_v1  ;;  %vm212_vm0 = vweird.f32 %v420_v1  ;;  %v168_v37 = vadd.f32 %v167_v29, %v166_v21  ;;  %v174_v38 = vadd.f32 %v173_v30, %v172_v22 }
  0x38   : > { %v180_v39 = vadd.f32 %v179_v31, %v178_v23  ;;  %v186_v40 = vadd.f32 %v185_v32, %v184_v24  ;;  %v163_v42 = vrot.slane %v162_v33, 1  ;;  %v192_v44 = vadd.f32 %v191_v35, %v190_v27  ;;  %p481_p9 = pnand %p480_p6, %p607_p11  ;;  %p486_p3 = por %p485_p1, %p484_p0 }
  0x39   : > { %v209_v18 = vsub.f32 1.0, %v208_v7  ;;  %v198_v45 = vadd.f32 %v197_v36, %v196_v28  ;;  %v169_v46 = vrot.slane %v168_v37, 1  ;;  %v175_v47 = vrot.slane %v174_v38, 1 }
  0x3a   : > { %v181_v48 = vrot.slane %v180_v39, 1  ;;  %v187_v49 = vrot.slane %v186_v40, 1  ;;  %v164_v50 = vadd.f32 %v163_v42, %v162_v33  ;;  %v193_v51 = vrot.slane %v192_v44, 1  ;;  %p482_p13 = pneg %p481_p9 }
  0x3b   : > { %v210_v26 = vmul.f32 %v420_v1, %v209_v18  ;;  %v199_v52 = vrot.slane %v198_v45, 1  ;;  %v170_v54 = vadd.f32 %v169_v46, %v168_v37  ;;  %v176_v55 = vadd.f32 %v175_v47, %v174_v38 }
  0x3c   : > { %v182_v56 = vadd.f32 %v181_v48, %v180_v39  ;;  %v188_v57 = vadd.f32 %v187_v49, %v186_v40  ;;  %v194_v59 = vadd.f32 %v193_v51, %v192_v44  ;;  %v202_v61 = vadd.f32 %v201_v53, %v695_v41  ;;  %p487_p4 = pnand %p486_p3, %p482_p13 }
  0x3d   : > { %v211_v34 = vadd.f32 %v420_v1, %v210_v26  ;;  %v200_v60 = vadd.f32 %v199_v52, %v198_v45 }
  0x3e   : > { %v203_v13 = vrot.slane %v202_v61, 2 }
  0x3f   : > { %v213_v43 = vsel %vm212_vm0, %v420_v1, %v211_v34 }
  0x40   : > { %v214_v58 = vmul.f32 %v213_v43, %v164_v50  ;;  %v215_v62 = vmul.f32 %v213_v43, %v170_v54  ;;  %v216_v63 = vmul.f32 %v213_v43, %v176_v55  ;;  %v217_v0 = vmul.f32 %v213_v43, %v182_v56 }
  0x41   : > { %v218_v1 = vmul.f32 %v213_v43, %v188_v57  ;;  %v219_v7 = vmul.f32 %v213_v43, %v194_v59  ;;  %v220_v12 = vmul.f32 %v213_v43, %v200_v60  ;;  %v204_v22 = vadd.f32 %v203_v13, %v202_v61 }
  0x42   : > { %v223_v6 = vmul.f32 %v658_v3, %v214_v58  ;;  %v224_v14 = vmul.f32 %v658_v3, %v215_v62  ;;  %v225_v15 = vmul.f32 %v658_v3, %v216_v63  ;;  %v226_v17 = vmul.f32 %v658_v3, %v217_v0 }
  0x43   : > { %v227_v18 = vmul.f32 %v658_v3, %v218_v1  ;;  %v228_v20 = vmul.f32 %v658_v3, %v219_v7  ;;  %v229_v21 = vmul.f32 %v658_v3, %v220_v12  ;;  %v205_v29 = vrot.slane %v204_v22, 1 }
  0x44   : > { %v231_v19 = vsub.f32 %v656_v2, %v223_v6  ;;  %v232_v23 = vsub.f32 %v661_v4, %v224_v14  ;;  %v233_v24 = vsub.f32 %v664_v5, %v225_v15  ;;  %v234_v25 = vsub.f32 %v670_v9, %v226_v17 }
  0x45   : > { %v235_v26 = vsub.f32 %v673_v10, %v227_v18  ;;  %v236_v28 = vsub.f32 %v676_v11, %v228_v20  ;;  %v237_v2 = vsub.f32 %v683_v16, %v229_v21  ;;  %v206_v5 = vadd.f32 %v205_v29, %v204_v22 }
  0x46   : > { %v240_v27 = vmul.f32 %v667_v8, %v231_v19  ;;  %v241_v30 = vmul.f32 %v667_v8, %v232_v23  ;;  %v242_v31 = vmul.f32 %v667_v8, %v233_v24  ;;  %v243_v32 = vmul.f32 %v667_v8, %v234_v25 }
  0x47   : > { %v244_v4 = vmul.f32 %v667_v8, %v235_v26  ;;  %v245_v9 = vmul.f32 %v667_v8, %v236_v28  ;;  %v246_v10 = vmul.f32 %v667_v8, %v237_v2  ;;  %v221_v11 = vmul.f32 %v213_v43, %v206_v5 }
  0x48   : > { %248 = vst [vmem:[%s146_s5] sm:$0xff] %v240_v27 }
  0x49   : > { %249 = vst [vmem:[%s146_s5 + $0x8] sm:$0xff] %v241_v30  ;;  %v230_v16 = vmul.f32 %v658_v3, %v221_v11 }
  0x4a   : > { %250 = vst [vmem:[%s146_s5 + $0x10] sm:$0xff] %v242_v31 }
  0x4b   : > { %251 = vst [vmem:[%s146_s5 + $0x18] sm:$0xff] %v243_v32  ;;  %v238_v33 = vsub.f32 %v695_v41, %v230_v16 }
  0x4c   : > { %252 = vst [vmem:[%s146_s5 + $0x20] sm:$0xff] %v244_v4 }
  0x4d   : > { %253 = vst [vmem:[%s146_s5 + $0x28] sm:$0xff] %v245_v9  ;;  %v247_v34 = vmul.f32 %v667_v8, %v238_v33 }
  0x4e   : > { %254 = vst [vmem:[%s146_s5 + $0x30] sm:$0xff] %v246_v10 }
  0x4f   : > { %255 = vst [vmem:[%s146_s5 + $0x38] sm:$0xff] %v247_v34 }
  0x50   : > { %490 = shalt.err (!%p487_p4)
}
  0x51   : > { %s537_s27 = smov 256   ;;  %s538_s28 = smov 16  }
  0x52   : > { %369 = dma.vmem_to_hbm [thread:$0]  (%p607_p11), %s271_s0, 1024, %s273_s9, %s257_s10, %s537_s27, %s537_s27, %s538_s28  }
  0x53 PF: > { %s287_s29 = sand.u32 1, %s519_s13   ;;  %p767_p7 = scmp.ge.s32.totalorder %s531_s16, 2 }
  0x54   : > { %s288_s30 = scalar_lea.sflag [#allocation6], %s287_s29 }
  0x55   : > { %p376_p5 = pnand %p767_p7, %p611_p12 }
  0x57   : > { %p377_p8 = pneg %p376_p5 }
  0x59   : > { %514 = dma.done.wait (%p377_p8), %s288_s30, 1024  }
  0x5a   : > { %516 = vsyncadd (%p377_p8), %s288_s30, 4294966272  ;;  %p23_p10 = scmp.ge.s32.totalorder %s582_s18, 4   ;;  %s768_s13 = smov %s523_s14 }
  0x5b   : > { %s769_s14 = smov %s527_s15  ;;  %s770_s15 = smov %s594_s21 }
  0x5c   : > { %s771_s16 = smov %s582_s18  ;;  %25 = sbr.rel (!%p23_p10) target bundleno = 11 (0xb), region = 69 }
  0x61   :  { %294 = vsyncpa [#allocation5], 1 }
  0x62   :  { %296 = vsyncpa [#allocation5 + $0x1], 1 }
  0x63   :  { %297 = vsyncpa [#allocation6], 1 }
  0x64   :  { %299 = vsyncpa [#allocation6 + $0x1], 1 }

</bundles_post_ra>
